<compile_context>
chip_gen: v7x
topology: tpu7x:2x2x1
jax: 0.10.0
libtpu: 0.0.40
codegen_flags: <defaults>
</compile_context>

<pallas_src>
import jax
import jax.numpy as jnp
from jax.experimental import pallas as pl
from jax.experimental.pallas import tpu as pltpu


def _round_up(v, m):
    return (v + m - 1) // m * m


def _vmem_cap_bytes():
    """Physical VMEM capacity for this generation (fallback: v7x-safe 64 MiB)."""
    try:
        return int(pltpu.get_tpu_info().vmem_capacity_bytes)
    except Exception:
        return 64 * 1024 * 1024


def _propagate_kernel(a_ref, t_ref, b_ref, o_ref):
    # a_ref : (TM, Np)     bf16 row tile of the normalized adjacency
    # t_ref : (Np, B*Fp)   bf16 pre-transformed features (X @ W), batch in lanes
    # b_ref : (1,  B*Fp)   f32 tiled bias
    # o_ref : (TM, B*Fp)   bf16 (layer 1) or f32 (layer 2)
    acc = jnp.dot(a_ref[...], t_ref[...], preferred_element_type=jnp.float32)
    o_ref[...] = (acc + b_ref[...]).astype(o_ref.dtype)


def _propagate(a_p, t_p, bias, *, tm, out_dtype):
    """out = A_norm @ T + bias, row-tiled over nodes."""
    Np = a_p.shape[0]
    F = t_p.shape[1]
    grid = (Np // tm,)

    # VMEM budget: actual resident bytes (double-buffered blocks + f32 acc),
    # clamped to 7/8 of this generation's physical VMEM (v7x: 64 MiB).
    out_itemsize = 2 if out_dtype == jnp.bfloat16 else 4
    resident = (2 * tm * Np * 2          # A row tile (bf16, 2 buffers)
                + 2 * Np * F * 2         # T (grid-invariant, still 2-buffered)
                + 2 * F * 4              # bias
                + 2 * tm * F * out_itemsize   # output tile
                + tm * F * 4)            # f32 accumulator
    vmem_limit = int(min(_vmem_cap_bytes() * 7 // 8,
                         max(16 * 1024 * 1024, 2 * resident)))

    # TODO(synk): for very large Np the full (Np, B*F) T block stops fitting
    # VMEM — add a K-tiled reduction over A's columns with a VMEM f32
    # accumulator and pl.when init/finalize.
    # TODO(synk): the grid-invariant T/bias specs could use
    # pipeline_mode=pl.Buffered(1) to drop their second VMEM buffer.
    return pl.pallas_call(
        _propagate_kernel,
        out_shape=jax.ShapeDtypeStruct((Np, F), out_dtype),
        grid_spec=pltpu.PrefetchScalarGridSpec(
            num_scalar_prefetch=0,
            grid=grid,
            in_specs=[
                pl.BlockSpec((tm, Np), lambda i: (i, 0)),   # A row tile
                pl.BlockSpec((Np, F), lambda i: (0, 0)),    # T = X @ W (full)
                pl.BlockSpec((1, F), lambda i: (0, 0)),     # bias
            ],
            out_specs=pl.BlockSpec((tm, F), lambda i: (i, 0)),
        ),
        compiler_params=pltpu.CompilerParams(
            dimension_semantics=("parallel",),   # v7x: shard row tiles over 2 TCs
            vmem_limit_bytes=vmem_limit,
        ),
    )(a_p, t_p, bias)


def _normalized_adjacency(edge_index, num_nodes):
    """D^{-1/2} (A + remaining self loops) D^{-1/2} as a dense (N, N) f32."""
    src = edge_index[0]
    dst = edge_index[1]
    adj = jnp.zeros((num_nodes, num_nodes), jnp.float32).at[dst, src].add(1.0)
    diag = jnp.diagonal(adj)
    adj = adj + jnp.diag(jnp.where(diag > 0, 0.0, 1.0))  # add_remaining_self_loops
    deg = adj.sum(axis=1)
    dinv = jnp.where(deg > 0, jax.lax.rsqrt(deg), 0.0)
    return dinv[:, None] * adj * dinv[None, :]


def gcn_forward(x, edge_index, w1, b1, w2, b2):
    """x: (B, N, Cin) float, edge_index: (2, E) int32.  Returns (B, N, Cout)."""
    x = x.astype(jnp.float32)
    B, N, Cin = x.shape
    H = w1.shape[1]
    Cout = w2.shape[1]

    # Row tile: 256 fills the v6e/v7x 2x256^2 MXU; 128 suffices for v5e and
    # for tiny graphs.
    tm = 128 if N <= 128 else 256
    Np = _round_up(N, tm)
    Hp = _round_up(H, 128)
    Coutp = _round_up(Cout, 128)

    # Dense normalized adjacency, zero-padded, bf16 (operand of both A dots).
    a = _normalized_adjacency(edge_index, N)
    a_p = jnp.zeros((Np, Np), jnp.float32).at[:N, :N].set(a).astype(jnp.bfloat16)

    def fold(t, fpad):
        # (B, n, F) -> lane-dense (Np, B*fpad) bf16, batch folded into lanes.
        b_, n_, f_ = t.shape
        out = jnp.zeros((Np, b_, fpad), jnp.float32)
        out = out.at[:n_, :, :f_].set(jnp.transpose(t, (1, 0, 2)))
        return out.reshape(Np, b_ * fpad).astype(jnp.bfloat16)

    def tile_bias(b_vec, fpad):
        bp = jnp.zeros((fpad,), jnp.float32).at[: b_vec.shape[0]].set(b_vec)
        return jnp.tile(bp, (B,)).reshape(1, B * fpad)

    # ---- layer 1: h = A_norm @ (X @ W1) + b1 ----
    # Tiny shared-weight transform stays in XLA (no 128-lane padding needed).
    t1 = jnp.einsum("bnc,ch->bnh", x.astype(jnp.bfloat16),
                    w1.astype(jnp.bfloat16),
                    preferred_element_type=jnp.float32)            # (B, N, H)
    h_folded = _propagate(a_p, fold(t1, Hp), tile_bias(b1, Hp),
                          tm=tm, out_dtype=jnp.bfloat16)           # (Np, B*Hp)

    # ---- layer 2: y = A_norm @ (H @ W2) + b2 ----
    h_bnh = jnp.transpose(h_folded.reshape(Np, B, Hp), (1, 0, 2))  # (B, Np, Hp)
    w2_p = jnp.zeros((Hp, Cout), jnp.float32).at[:H, :].set(w2).astype(jnp.bfloat16)
    t2 = jnp.einsum("bnh,ho->bno", h_bnh, w2_p,
                    preferred_element_type=jnp.float32)            # (B, Np, Cout)
    y_folded = _propagate(a_p, fold(t2, Coutp), tile_bias(b2, Coutp),
                          tm=tm, out_dtype=jnp.float32)            # (Np, B*Coutp)

    y = jnp.transpose(y_folded.reshape(Np, B, Coutp), (1, 0, 2))
    return y[:, :N, :Cout]


def _reference(x, edge_index, w1, b1, w2, b2):
    # pure-JAX reference mirroring the bf16-operand / f32-accumulate path
    x = x.astype(jnp.float32)
    a = _normalized_adjacency(edge_index, x.shape[1])

    def bf(v):
        return v.astype(jnp.bfloat16).astype(jnp.float32)

    a_b = bf(a)
    t1 = jnp.einsum("bnc,ch->bnh", bf(x), bf(w1))
    h = jnp.einsum("nm,bmh->bnh", a_b, bf(t1)) + b1
    t2 = jnp.einsum("bnh,ho->bno", bf(h), bf(w2))
    y = jnp.einsum("nm,bmo->bno", a_b, bf(t2)) + b2
    return y


if __name__ == "__main__":
    key = jax.random.PRNGKey(0)
    k_x, k_w1, k_b1, k_w2, k_b2 = jax.random.split(key, 5)

    B, N = 2, 16          # batch, num_nodes
    C_in, C_hid, C_out = 8, 32, 16

    x = jax.random.normal(k_x, (B, N, C_in), dtype=jnp.float32)

    # small deterministic graph: ring with both directions
    idx = jnp.arange(N, dtype=jnp.int32)
    src = jnp.concatenate([idx, (idx + 1) % N])
    dst = jnp.concatenate([(idx + 1) % N, idx])
    edge_index = jnp.stack([src, dst], axis=0)

    # deterministic parameter init (glorot-ish scaling)
    w1 = jax.random.normal(k_w1, (C_in, C_hid), jnp.float32) * (1.0 / jnp.sqrt(C_in))
    b1 = jax.random.normal(k_b1, (C_hid,), jnp.float32) * 0.01
    w2 = jax.random.normal(k_w2, (C_hid, C_out), jnp.float32) * (1.0 / jnp.sqrt(C_hid))
    b2 = jax.random.normal(k_b2, (C_out,), jnp.float32) * 0.01

    out = gcn_forward(x, edge_index, w1, b1, w2, b2)
    out = jax.block_until_ready(out)

    ref = _reference(x, edge_index, w1, b1, w2, b2)
    assert out.shape == (B, N, C_out)
    err = float(jnp.max(jnp.abs(out - ref)))
    assert jnp.allclose(out, ref, atol=2e-2, rtol=2e-2), err

    print("KERNEL_OK")
</pallas_src>

<mosaic_0001>
module attributes {stable_mosaic.version = 11 : i64} {
  func.func @_propagate_kernel(%arg0: i32, %arg1: memref<128x128xbf16, #tpu.memory_space<vmem>>, %arg2: memref<128x256xbf16, #tpu.memory_space<vmem>>, %arg3: memref<1x256xf32, #tpu.memory_space<vmem>>, %arg4: memref<128x256xbf16, #tpu.memory_space<vmem>>) attributes {dimension_semantics = [#tpu.dimension_semantics<parallel>], iteration_bounds = array<i64: 1>, scalar_prefetch = 0 : i64, scratch_operands = 0 : i64, tpu.core_type = #tpu.core_type<tc>, window_params = [{transform_indices = @transform_0, window_bounds = array<i64: 128, 128>}, {pipeline_mode = #tpu.pipeline_mode<synchronous>, transform_indices = @transform_1, window_bounds = array<i64: 128, 256>}, {pipeline_mode = #tpu.pipeline_mode<synchronous>, transform_indices = @transform_2, window_bounds = array<i64: 1, 256>}, {transform_indices = @transform_3, window_bounds = array<i64: 128, 256>}]} {
    %c0 = arith.constant 0 : index
    %c0_0 = arith.constant 0 : index
    %0 = vector.load %arg1[%c0, %c0_0] : memref<128x128xbf16, #tpu.memory_space<vmem>>, vector<128x128xbf16>
    %c0_1 = arith.constant 0 : index
    %c0_2 = arith.constant 0 : index
    %1 = vector.load %arg2[%c0_1, %c0_2] : memref<128x256xbf16, #tpu.memory_space<vmem>>, vector<128x256xbf16>
    %cst = arith.constant dense<0.000000e+00> : vector<128x256xf32>
    %2 = tpu.matmul %0, %1, %cst {dimension_numbers = #tpu.dot_dimension_numbers<[1], [0], [0], [1], [0, 0, 1, 1], [], []>} : vector<128x128xbf16>, vector<128x256xbf16>, vector<128x256xf32> -> vector<128x256xf32>
    %c0_3 = arith.constant 0 : index
    %c0_4 = arith.constant 0 : index
    %3 = vector.load %arg3[%c0_3, %c0_4] : memref<1x256xf32, #tpu.memory_space<vmem>>, vector<1x256xf32>
    %4 = vector.broadcast %3 : vector<1x256xf32> to vector<128x256xf32>
    %5 = arith.addf %2, %4 : vector<128x256xf32>
    %6 = arith.truncf %5 : vector<128x256xf32> to vector<128x256xbf16>
    %c0_5 = arith.constant 0 : index
    %c0_6 = arith.constant 0 : index
    %7 = vector.load %arg4[%c0_5, %c0_6] : memref<128x256xbf16, #tpu.memory_space<vmem>>, vector<128x256xbf16>
    tpu.vector_store %arg4[%c0_5, %c0_6], %6 {strides = array<i32>} : memref<128x256xbf16, #tpu.memory_space<vmem>>, vector<128x256xbf16>,
    return
  }
  func.func @transform_0(%arg0: i32) -> (i32, i32) {
    %c0_i32 = arith.constant 0 : i32
    %c0_i32_0 = arith.constant 0 : i32
    return %arg0, %c0_i32 : i32, i32
  }
  func.func @transform_1(%arg0: i32) -> (i32, i32) {
    %c0_i32 = arith.constant 0 : i32
    %c0_i32_0 = arith.constant 0 : i32
    %c0_i32_1 = arith.constant 0 : i32
    return %c0_i32, %c0_i32_0 : i32, i32
  }
  func.func @transform_2(%arg0: i32) -> (i32, i32) {
    %c0_i32 = arith.constant 0 : i32
    %c0_i32_0 = arith.constant 0 : i32
    %c0_i32_1 = arith.constant 0 : i32
    return %c0_i32, %c0_i32_0 : i32, i32
  }
  func.func @transform_3(%arg0: i32) -> (i32, i32) {
    %c0_i32 = arith.constant 0 : i32
    %c0_i32_0 = arith.constant 0 : i32
    return %arg0, %c0_i32 : i32, i32
  }
}

</mosaic_0001>

<bundles_post_ra>
// kernel: tpu_custom_call.1
= control target key start
LH: loop header
LB: loop body
LE: loop exit
PB: predicated region body
PF: predicated region fallthrough
CT: control target
= control target key end

     0   :  { %8 = vsyncpa [#allocation3], 0  ;;  %s760_s0 = inlined_call_operand.hbm [shape: bf16[128,128], index: 0, kind: input, shape index: {}]   ;;  %s761_s1 = inlined_call_operand.hbm [shape: bf16[128,256], index: 1, kind: input, shape index: {}]   ;;  %s762_s2 = inlined_call_operand.vmem [shape: f32[1,256], index: 2, kind: input, shape index: {}]   ;;  %s763_s3 = inlined_call_operand.hbm [shape: bf16[128,256], index: 3, kind: output, shape index: {}]  }
   0x1   :  { %9 = vsyncpa [#allocation6], 0 }
   0x2   :  { %10 = vsyncpa [#allocation4], 0  ;;  %s643_s12 = smov [#allocation2]   ;;  %s571_s16 = scalar_lea.hbm %s760_s0, 1024 }
   0x3   :  { %s16_s13 = sshll.u32 %s643_s12, 4  ;;  %p572_p0 = scmp.ne.s32.totalorder %s760_s0, %s571_s16  ;;  %s17_s13 = int_to_ptr.vmem [resolvable:$true] %s16_s13 }
   0x4   :  { %p575_p1 = scmp.lt.u32.totalorder %s571_s16, %s760_s0 }
   0x6   :  { %p577_p2 = pnand %p575_p1, %p572_p0 }
   0x8   :  { %580 = shalt.err (!%p577_p2)
}
   0x9   :  { %s581_s21 = scalar_lea.vmem %s17_s13, 1024  ;;  %p586_p4 = scmp.lt.s32.totalorder %s17_s13, %s17_s13 }
   0xa   :  { %p582_p3 = scmp.ne.s32.totalorder %s17_s13, %s581_s21  ;;  %p587_p5 = scmp.lt.s32.totalorder %s581_s21, %s581_s21 }
   0xc   :  { %p588_p6 = por %p587_p5, %p586_p4 }
   0xe   :  { %p589_p7 = pnand %p588_p6, %p582_p3 }
  0x10   :  { %592 = shalt.err (!%p589_p7)
}
  0x11   :  { %s644_s22 = smov 64   ;;  %s645_s23 = smov 4  }
  0x12   :  { %22 = dma.hbm_to_vmem [thread:$0]  %s760_s0, 1024, %s17_s13, [#allocation3], %s644_s22, %s644_s22, %s645_s23  }
  0x13   :  { %s646_s26 = smov [#allocation5]   ;;  %s593_s30 = scalar_lea.hbm %s761_s1, 2048 }
  0x14   :  { %s28_s27 = sshll.u32 %s646_s26, 4  ;;  %p594_p8 = scmp.ne.s32.totalorder %s761_s1, %s593_s30  ;;  %s29_s27 = int_to_ptr.vmem [resolvable:$true] %s28_s27 }
  0x15   :  { %p597_p9 = scmp.lt.u32.totalorder %s593_s30, %s761_s1 }
  0x17   :  { %p599_p10 = pnand %p597_p9, %p594_p8 }
  0x19   :  { %602 = shalt.err (!%p599_p10)
}
  0x1a   :  { %s603_s8 = scalar_lea.vmem %s29_s27, 2048  ;;  %p608_p12 = scmp.lt.s32.totalorder %s29_s27, %s29_s27 }
  0x1b   :  { %p604_p11 = scmp.ne.s32.totalorder %s29_s27, %s603_s8  ;;  %p609_p13 = scmp.lt.s32.totalorder %s603_s8, %s603_s8 }
  0x1d   :  { %p610_p0 = por %p609_p13, %p608_p12 }
  0x1f   :  { %p611_p1 = pnand %p610_p0, %p604_p11 }
  0x21   :  { %614 = shalt.err (!%p611_p1)
}
  0x22   :  { %s647_s0 = smov 128   ;;  %s648_s9 = smov 8  }
  0x23   :  { %34 = dma.hbm_to_vmem [thread:$0]  %s761_s1, 2048, %s29_s27, [#allocation6], %s647_s0, %s647_s0, %s648_s9  }
  0x24   :  { %637 = dma.done.wait [#allocation3], 1024  }
  0x25   :  { %638 = vsyncadd [#allocation3], 4294966272 }
  0x26   :  { %639 = dma.done.wait [#allocation6], 2048  }
  0x27   :  { %640 = vsyncadd [#allocation6], 4294965248  ;;  %v649_v0 = vmov 0   ;;  %v539_v1 = vld [vmem:[#allocation5 + $0x4] ss:$8 sps:$4 sm:$0xff]   ;;  %v567_v21 = vld [vmem:[#allocation2 + $0x10] sm:$0xff]   ;;  %v78_v25 = vlaneseq }
  0x28   :  { %248 = vmatprep.mubr.bf16.mxu0 %v649_v0  ;;  %288 = vmatprep.mubr.bf16.mxu1 %v649_v0  ;;  %v541_v2 = vld [vmem:[#allocation5] ss:$8 sps:$4 sm:$0xff]   ;;  %v542_v3 = vld [vmem:[#allocation5 + $0x14] ss:$8 sps:$4 sm:$0xff]   ;;  %v544_v4 = vld [vmem:[#allocation5 + $0x10] ss:$8 sps:$4 sm:$0xff]  }
  0x29   :  { %216 = vmatprep.subr.bf16.mxu0 %v539_v1  ;;  %515 = vmatprep.subr.bf16.mxu1 %v539_v1  ;;  %v545_v5 = vld [vmem:[#allocation5 + $0x24] ss:$8 sps:$4 sm:$0xff]   ;;  %v547_v6 = vld [vmem:[#allocation5 + $0x20] ss:$8 sps:$4 sm:$0xff]   ;;  %v548_v7 = vld [vmem:[#allocation5 + $0x34] ss:$8 sps:$4 sm:$0xff]  }
  0x2a   :  { %217 = vmatpush1.bf16.msra.mxu0 %v541_v2  ;;  %523 = vmatpush1.bf16.msra.mxu1 %v541_v2  ;;  %v550_v8 = vld [vmem:[#allocation5 + $0x30] ss:$8 sps:$4 sm:$0xff]   ;;  %v551_v9 = vld [vmem:[#allocation5 + $0x44] ss:$8 sps:$4 sm:$0xff]   ;;  %v553_v10 = vld [vmem:[#allocation5 + $0x40] ss:$8 sps:$4 sm:$0xff]  }
  0x2b   :  { %218 = vmatprep.subr.bf16.mxu0 %v542_v3  ;;  %516 = vmatprep.subr.bf16.mxu1 %v542_v3  ;;  %v554_v11 = vld [vmem:[#allocation5 + $0x54] ss:$8 sps:$4 sm:$0xff]   ;;  %v556_v12 = vld [vmem:[#allocation5 + $0x50] ss:$8 sps:$4 sm:$0xff]   ;;  %v557_v13 = vld [vmem:[#allocation5 + $0x64] ss:$8 sps:$4 sm:$0xff]  }
  0x2c   :  { %v559_v14 = vld [vmem:[#allocation5 + $0x60] ss:$8 sps:$4 sm:$0xff]   ;;  %v560_v15 = vld [vmem:[#allocation5 + $0x74] ss:$8 sps:$4 sm:$0xff]   ;;  %v562_v16 = vld [vmem:[#allocation5 + $0x70] ss:$8 sps:$4 sm:$0xff]  }
  0x2d   :  { %v563_v17 = vld [vmem:[#allocation2] sm:$0xff]   ;;  %v565_v19 = vld [vmem:[#allocation2 + $0x8] sm:$0xff]   ;;  %v568_v22 = vld [vmem:[#allocation2 + $0x30] sm:$0xff]   ;;  %v79_v26 = vshrl.u32 %v78_v25, 7 }
  0x2e   :  { %219 = vmatpush1.bf16.msra.mxu0 %v544_v4  ;;  %524 = vmatpush1.bf16.msra.mxu1 %v544_v4  ;;  %v564_v18 = vld [vmem:[#allocation2 + $0x20] sm:$0xff]   ;;  %v566_v20 = vld [vmem:[#allocation2 + $0x28] sm:$0xff]   ;;  %v569_v23 = vld [vmem:[#allocation2 + $0x18] sm:$0xff]  }
  0x2f   :  { %220 = vmatprep.subr.bf16.mxu0 %v545_v5  ;;  %517 = vmatprep.subr.bf16.mxu1 %v545_v5  ;;  %v570_v24 = vld [vmem:[#allocation2 + $0x38] sm:$0xff]   ;;  %v80_v27 = vsub.s32 0, %v79_v26  ;;  %v76_v28 = vld [vmem:[%s762_s2] sm:$0x3]  ;;  %v84_v29 = vsub.s32 1, %v79_v26  ;;  %s650_s2 = smov [#allocation7]  }
  0x30   :  { %s446_s13 = sshll.u32 %s650_s2, 4  ;;  %s447_s13 = int_to_ptr.vmem [resolvable:$true] %s446_s13 }
  0x31   :  { %v709_v30 = vrot.slane %v76_v28, %v80_v27  ;;  %v711_v31 = vrot.slane %v76_v28, %v84_v29  ;;  %s615_s14 = scalar_lea.vmem %s447_s13, 2048  ;;  %p620_p3 = scmp.lt.s32.totalorder %s447_s13, %s447_s13 }
  0x32   :  { %221 = vmatpush1.bf16.msra.mxu0 %v547_v6  ;;  %525 = vmatpush1.bf16.msra.mxu1 %v547_v6  ;;  %p616_p2 = scmp.ne.s32.totalorder %s447_s13, %s615_s14  ;;  %p621_p4 = scmp.lt.s32.totalorder %s615_s14, %s615_s14 }
  0x33   :  { %222 = vmatprep.subr.bf16.mxu0 %v548_v7  ;;  %518 = vmatprep.subr.bf16.mxu1 %v548_v7 }
  0x34   :  { %p622_p5 = por %p621_p4, %p620_p3 }
  0x36   :  { %223 = vmatpush1.bf16.msra.mxu0 %v550_v8  ;;  %526 = vmatpush1.bf16.msra.mxu1 %v550_v8  ;;  %p623_p6 = pnand %p622_p5, %p616_p2 }
  0x37   :  { %224 = vmatprep.subr.bf16.mxu0 %v551_v9  ;;  %519 = vmatprep.subr.bf16.mxu1 %v551_v9 }
  0x3a   :  { %225 = vmatpush1.bf16.msra.mxu0 %v553_v10  ;;  %527 = vmatpush1.bf16.msra.mxu1 %v553_v10 }
  0x3b   :  { %226 = vmatprep.subr.bf16.mxu0 %v554_v11  ;;  %520 = vmatprep.subr.bf16.mxu1 %v554_v11 }
  0x3e   :  { %227 = vmatpush1.bf16.msra.mxu0 %v556_v12  ;;  %528 = vmatpush1.bf16.msra.mxu1 %v556_v12 }
  0x3f   :  { %228 = vmatprep.subr.bf16.mxu0 %v557_v13  ;;  %521 = vmatprep.subr.bf16.mxu1 %v557_v13 }
  0x42   :  { %229 = vmatpush1.bf16.msra.mxu0 %v559_v14  ;;  %529 = vmatpush1.bf16.msra.mxu1 %v559_v14 }
  0x43   :  { %230 = vmatprep.subr.bf16.mxu0 %v560_v15  ;;  %522 = vmatprep.subr.bf16.mxu1 %v560_v15 }
  0x46   :  { %231 = vmatpush1.bf16.msra.mxu0 %v562_v16  ;;  %530 = vmatpush1.bf16.msra.mxu1 %v562_v16 }
  0x49   :  { %249 = vmatmul.mubr.bf16.vlgmr.msra.gmra.mrb[0].mxu0 %v563_v17  ;;  %289 = vmatmul.mubr.bf16.vlgmr.msra.gmra.mrb[0].mxu1 %v564_v18 }
  0x4a   :  { %258 = vmatprep.mubr.bf16.mxu0 %v649_v0  ;;  %298 = vmatprep.mubr.bf16.mxu1 %v649_v0 }
  0x51   :  { %259 = vmatmul.mubr.bf16.gmra.mrb[4].mxu0 %v565_v19  ;;  %299 = vmatmul.mubr.bf16.gmra.mrb[4].mxu1 %v566_v20 }
  0x52   :  { %268 = vmatprep.mubr.bf16.mxu0 %v649_v0  ;;  %308 = vmatprep.mubr.bf16.mxu1 %v649_v0 }
  0x59   :  { %269 = vmatmul.mubr.bf16.gmra.mrb[8].mxu0 %v567_v21  ;;  %309 = vmatmul.mubr.bf16.gmra.mrb[8].mxu1 %v568_v22 }
  0x5a   :  { %278 = vmatprep.mubr.bf16.mxu0 %v649_v0  ;;  %318 = vmatprep.mubr.bf16.mxu1 %v649_v0 }
  0x61   :  { %279 = vmatmul.mubr.bf16.gmra.mrb[12].mxu0 %v569_v23  ;;  %319 = vmatmul.mubr.bf16.gmra.mrb[12].mxu1 %v570_v24 }
 0x11c   :  { %v250_v32 = vpop.f32.mrb[0].mxu0  ;;  %v290_v33 = vpop.f32.mrb[0].mxu1 }
 0x11d   :  { %v251_v34 = vadd.f32 %v250_v32, %v709_v30  ;;  %v291_v35 = vadd.f32 %v290_v33, %v709_v30  ;;  %v252_v36 = vpop.f32.mrb[1].mxu0  ;;  %v292_v37 = vpop.f32.mrb[1].mxu1 }
 0x11e   :  { %v253_v38 = vadd.f32 %v252_v36, %v711_v31  ;;  %v293_v39 = vadd.f32 %v292_v37, %v711_v31  ;;  %v254_v40 = vpop.f32.mrb[2].mxu0  ;;  %v294_v41 = vpop.f32.mrb[2].mxu1 }
 0x11f   :  { %v255_v42 = vadd.f32 %v254_v40, %v709_v30  ;;  %v295_v43 = vadd.f32 %v294_v41, %v709_v30  ;;  %v256_v44 = vpop.f32.mrb[3].mxu0  ;;  %v296_v45 = vpop.f32.mrb[3].mxu1 }
 0x120   :  { %v499_v46 = vpack.c.bf16 %v253_v38, %v251_v34  ;;  %v507_v47 = vpack.c.bf16 %v293_v39, %v291_v35  ;;  %v257_v48 = vadd.f32 %v256_v44, %v711_v31  ;;  %v297_v49 = vadd.f32 %v296_v45, %v711_v31 }
 0x122   :  { %425 = vst [vmem:[#allocation7] sm:$0xff] %v499_v46  ;;  %433 = vst [vmem:[#allocation7 + $0x40] sm:$0xff] %v507_v47  ;;  %v500_v50 = vpack.c.bf16 %v257_v48, %v255_v42  ;;  %v508_v51 = vpack.c.bf16 %v297_v49, %v295_v43 }
 0x124   :  { %426 = vst [vmem:[#allocation7 + $0x8] sm:$0xff] %v500_v50  ;;  %434 = vst [vmem:[#allocation7 + $0x48] sm:$0xff] %v508_v51  ;;  %v260_v52 = vpop.f32.mrb[4].mxu0  ;;  %v300_v53 = vpop.f32.mrb[4].mxu1 }
 0x125   :  { %v261_v54 = vadd.f32 %v260_v52, %v709_v30  ;;  %v301_v55 = vadd.f32 %v300_v53, %v709_v30  ;;  %v262_v56 = vpop.f32.mrb[5].mxu0  ;;  %v302_v57 = vpop.f32.mrb[5].mxu1 }
 0x126   :  { %v263_v58 = vadd.f32 %v262_v56, %v711_v31  ;;  %v303_v59 = vadd.f32 %v302_v57, %v711_v31  ;;  %v264_v60 = vpop.f32.mrb[6].mxu0  ;;  %v304_v61 = vpop.f32.mrb[6].mxu1 }
 0x127   :  { %v265_v62 = vadd.f32 %v264_v60, %v709_v30  ;;  %v305_v63 = vadd.f32 %v304_v61, %v709_v30  ;;  %v266_v0 = vpop.f32.mrb[7].mxu0  ;;  %v306_v1 = vpop.f32.mrb[7].mxu1 }
 0x128   :  { %v501_v2 = vpack.c.bf16 %v263_v58, %v261_v54  ;;  %v509_v3 = vpack.c.bf16 %v303_v59, %v301_v55  ;;  %v267_v4 = vadd.f32 %v266_v0, %v711_v31  ;;  %v307_v5 = vadd.f32 %v306_v1, %v711_v31 }
 0x12a   :  { %427 = vst [vmem:[#allocation7 + $0x10] sm:$0xff] %v501_v2  ;;  %435 = vst [vmem:[#allocation7 + $0x50] sm:$0xff] %v509_v3  ;;  %v502_v6 = vpack.c.bf16 %v267_v4, %v265_v62  ;;  %v510_v7 = vpack.c.bf16 %v307_v5, %v305_v63 }
 0x12c   :  { %428 = vst [vmem:[#allocation7 + $0x18] sm:$0xff] %v502_v6  ;;  %436 = vst [vmem:[#allocation7 + $0x58] sm:$0xff] %v510_v7  ;;  %v270_v8 = vpop.f32.mrb[8].mxu0  ;;  %v310_v9 = vpop.f32.mrb[8].mxu1 }
 0x12d   :  { %v271_v10 = vadd.f32 %v270_v8, %v709_v30  ;;  %v311_v11 = vadd.f32 %v310_v9, %v709_v30  ;;  %v272_v12 = vpop.f32.mrb[9].mxu0  ;;  %v312_v13 = vpop.f32.mrb[9].mxu1 }
 0x12e   :  { %v273_v14 = vadd.f32 %v272_v12, %v711_v31  ;;  %v313_v15 = vadd.f32 %v312_v13, %v711_v31  ;;  %v274_v16 = vpop.f32.mrb[10].mxu0  ;;  %v314_v17 = vpop.f32.mrb[10].mxu1 }
 0x12f   :  { %v275_v18 = vadd.f32 %v274_v16, %v709_v30  ;;  %v315_v19 = vadd.f32 %v314_v17, %v709_v30  ;;  %v276_v20 = vpop.f32.mrb[11].mxu0  ;;  %v316_v21 = vpop.f32.mrb[11].mxu1 }
 0x130   :  { %v503_v22 = vpack.c.bf16 %v273_v14, %v271_v10  ;;  %v511_v23 = vpack.c.bf16 %v313_v15, %v311_v11  ;;  %v277_v24 = vadd.f32 %v276_v20, %v711_v31  ;;  %v317_v25 = vadd.f32 %v316_v21, %v711_v31 }
 0x132   :  { %429 = vst [vmem:[#allocation7 + $0x20] sm:$0xff] %v503_v22  ;;  %437 = vst [vmem:[#allocation7 + $0x60] sm:$0xff] %v511_v23  ;;  %v504_v26 = vpack.c.bf16 %v277_v24, %v275_v18  ;;  %v512_v27 = vpack.c.bf16 %v317_v25, %v315_v19 }
 0x134   :  { %430 = vst [vmem:[#allocation7 + $0x28] sm:$0xff] %v504_v26  ;;  %438 = vst [vmem:[#allocation7 + $0x68] sm:$0xff] %v512_v27  ;;  %v280_v28 = vpop.f32.mrb[12].mxu0  ;;  %v320_v29 = vpop.f32.mrb[12].mxu1 }
 0x135   :  { %v281_v32 = vadd.f32 %v280_v28, %v709_v30  ;;  %v321_v33 = vadd.f32 %v320_v29, %v709_v30  ;;  %v282_v34 = vpop.f32.mrb[13].mxu0  ;;  %v322_v35 = vpop.f32.mrb[13].mxu1 }
 0x136   :  { %v283_v36 = vadd.f32 %v282_v34, %v711_v31  ;;  %v323_v37 = vadd.f32 %v322_v35, %v711_v31  ;;  %v284_v38 = vpop.f32.mrb[14].mxu0  ;;  %v324_v39 = vpop.f32.mrb[14].mxu1 }
 0x137   :  { %v285_v40 = vadd.f32 %v284_v38, %v709_v30  ;;  %v325_v41 = vadd.f32 %v324_v39, %v709_v30  ;;  %v286_v42 = vpop.f32.mrb[15].mxu0  ;;  %v326_v43 = vpop.f32.mrb[15].mxu1 }
 0x138   :  { %v505_v44 = vpack.c.bf16 %v283_v36, %v281_v32  ;;  %v513_v45 = vpack.c.bf16 %v323_v37, %v321_v33  ;;  %v287_v46 = vadd.f32 %v286_v42, %v711_v31  ;;  %v327_v47 = vadd.f32 %v326_v43, %v711_v31 }
 0x13a   :  { %431 = vst [vmem:[#allocation7 + $0x30] sm:$0xff] %v505_v44  ;;  %439 = vst [vmem:[#allocation7 + $0x70] sm:$0xff] %v513_v45  ;;  %v506_v48 = vpack.c.bf16 %v287_v46, %v285_v40  ;;  %v514_v49 = vpack.c.bf16 %v327_v47, %v325_v41 }
 0x13c   :  { %432 = vst [vmem:[#allocation7 + $0x38] sm:$0xff] %v506_v48  ;;  %440 = vst [vmem:[#allocation7 + $0x78] sm:$0xff] %v514_v49 }
 0x13d   :  { %626 = shalt.err (!%p623_p6)
}
 0x13e   :  { %s627_s17 = scalar_lea.hbm %s763_s3, 2048 }
 0x13f   :  { %p628_p7 = scmp.ne.s32.totalorder %s763_s3, %s627_s17  ;;  %p631_p8 = scmp.lt.u32.totalorder %s627_s17, %s763_s3 }
 0x141   :  { %p633_p9 = pnand %p631_p8, %p628_p7 }
 0x143   :  { %636 = shalt.err (!%p633_p9)
}
 0x144   :  { %452 = dma.vmem_to_hbm [thread:$0]  %s447_s13, 2048, %s763_s3, [#allocation4], %s647_s0, %s647_s0, %s648_s9  }
 0x145   :  { %641 = dma.done.wait [#allocation4], 2048  }
 0x146   :  { %642 = vsyncadd [#allocation4], 4294965248 }
 0x147   :  { %456 = vsyncpa [#allocation3], 1 }
 0x148   :  { %457 = vsyncpa [#allocation6], 1 }
 0x149   :  { %458 = vsyncpa [#allocation4], 1 }

</bundles_post_ra>
